<compile_context>
chip_gen: v6e
topology: v6e:2x2x1
jax: 0.10.0
libtpu: 0.0.40
codegen_flags: <defaults>
</compile_context>

<pallas_src>
import functools
import math

import jax
import jax.numpy as jnp
from jax.experimental import pallas as pl
from jax.experimental.pallas import tpu as pltpu


# --------------------------------------------------------------------------
# Kernel: out = x * sqrt(E) + pe   (pe broadcasts over the folded batch dim)
# --------------------------------------------------------------------------
def _pos_enc_kernel(x_ref, pe_ref, o_ref, *, scale):
    # x_ref/o_ref: (bb, ts, E)   pe_ref: (ts, E)
    # `scale` is a weakly-typed Python float, so the multiply stays in x.dtype.
    o_ref[...] = (x_ref[...] * scale + pe_ref[...]).astype(o_ref.dtype)


# --------------------------------------------------------------------------
# pe table — vectorized equivalent of the PyTorch __init__ double loop
# (literal formula: exponent 2*i/E with i the even column index).
# --------------------------------------------------------------------------
def make_positional_encoding_table(max_seq_len, embedding_dimensions,
                                   dtype=jnp.float32):
    E = embedding_dimensions
    pos = jnp.arange(max_seq_len, dtype=jnp.float32)[:, None]      # (S, 1)
    i = jnp.arange(0, E, 2, dtype=jnp.float32)[None, :]            # (1, E/2)
    angle = pos / jnp.power(10000.0, (2.0 * i) / float(E))         # (S, E/2)
    pe = jnp.stack([jnp.sin(angle), jnp.cos(angle)], axis=-1)      # (S, E/2, 2)
    return pe.reshape(max_seq_len, E).astype(dtype)


# --------------------------------------------------------------------------
# Tile selection
# --------------------------------------------------------------------------
def _choose_tiles(B, S, E, itemsize, target_block_bytes):
    row_bytes = E * itemsize
    # Sequence tile: full extent if it is small or not a multiple of 8
    # (full-extent blocks are always layout-legal against x), otherwise the
    # largest multiple of 8 that keeps one batch-row's tile under the target.
    if S % 8 != 0 or S * row_bytes <= target_block_bytes:
        ts = S
    else:
        ts = min(S, max(8, (target_block_bytes // row_bytes) // 8 * 8))
    # Fold batch elements into the block until the x block reaches the target;
    # force bb to divide B so there are no partial leading-dim blocks.
    bb = int(max(1, min(B, target_block_bytes // max(ts * row_bytes, 1))))
    while B % bb:
        bb -= 1
    return bb, ts


# --------------------------------------------------------------------------
# Wrapper
# --------------------------------------------------------------------------
def positional_encoding(x, pe, *, target_block_bytes=2 << 20):
    """x: (B, S, E); pe: (max_seq_len, E) with max_seq_len >= S."""
    B, S, E = x.shape
    max_seq, E_pe = pe.shape
    assert max_seq >= S and E_pe == E, "pe table too small"
    scale = math.sqrt(E)
    itemsize = x.dtype.itemsize

    # Match pe to the activation dtype (saves half the pe bytes for bf16 x and
    # keeps the in-kernel add / store dtype-clean).
    pe = pe.astype(x.dtype)

    bb, ts = _choose_tiles(B, S, E, itemsize, target_block_bytes)
    n_s = pl.cdiv(S, ts)
    n_b = B // bb

    # Prefer passing the full pe table (no wrapper-side slice/copy).  Only
    # slice to the first S rows when ts is not a multiple of 8 (layout rule
    # against the full table) or a touched block would run past max_seq_len.
    if ts % 8 == 0 and n_s * ts <= max_seq:
        pe_in = pe
    else:
        pe_in = pe[:S]

    kernel = functools.partial(_pos_enc_kernel, scale=scale)

    flops = 2 * B * S * E                              # one mul + one add
    # pe is streamed once per sequence tile (batch is the inner grid axis and
    # folded into the block), so it is counted once.
    bytes_accessed = (2 * B * S * E + n_s * ts * E) * itemsize

    out = pl.pallas_call(
        kernel,
        out_shape=jax.ShapeDtypeStruct((B, S, E), x.dtype),
        # s outer / b inner: pe's block index is constant across consecutive
        # inner steps, so Pallas does not re-issue its DMA per batch tile.
        grid=(n_s, n_b),
        in_specs=[
            pl.BlockSpec((bb, ts, E), lambda s, b: (b, s, 0)),   # x tile
            pl.BlockSpec((ts, E), lambda s, b: (s, 0)),          # pe tile
        ],
        out_specs=pl.BlockSpec((bb, ts, E), lambda s, b: (b, s, 0)),
        compiler_params=pltpu.CompilerParams(
            dimension_semantics=("parallel", "parallel")),
        cost_estimate=pl.CostEstimate(
            flops=flops, transcendentals=0, bytes_accessed=bytes_accessed),
    )(x, pe_in)
    return out


# --------------------------------------------------------------------------
# Demo / self-check
# --------------------------------------------------------------------------
if __name__ == "__main__":
    max_seq_len = 64
    embedding_dimensions = 128        # multiple of 128 -> lane-dense stores
    batch, seq = 2, 8

    key = jax.random.PRNGKey(0)
    x = jax.random.normal(key, (batch, seq, embedding_dimensions), jnp.float32)

    pe = make_positional_encoding_table(max_seq_len, embedding_dimensions)

    # Spot-check the table against the literal PyTorch double-loop formula.
    pe_host = jax.device_get(pe)
    E = embedding_dimensions
    for pos in range(4):
        for i in range(0, E, 2):
            ref_s = math.sin(pos / 10000 ** (2 * i / E))
            ref_c = math.cos(pos / 10000 ** (2 * i / E))
            assert abs(float(pe_host[pos, i]) - ref_s) < 1e-5
            assert abs(float(pe_host[pos, i + 1]) - ref_c) < 1e-5

    out = jax.block_until_ready(positional_encoding(x, pe))

    # Pure-JAX reference of the forward pass.
    ref = x * math.sqrt(embedding_dimensions) + pe[None, :seq, :]
    assert out.shape == x.shape
    assert jnp.allclose(out, ref, atol=1e-5, rtol=1e-5), "mismatch vs reference"

    print("KERNEL_OK")
</pallas_src>

<mosaic_0001>
module attributes {stable_mosaic.version = 11 : i64} {
  func.func @_pos_enc_kernel(%arg0: i32, %arg1: i32, %arg2: memref<2x8x128xf32, #tpu.memory_space<vmem>>, %arg3: memref<8x128xf32, #tpu.memory_space<vmem>>, %arg4: memref<2x8x128xf32, #tpu.memory_space<vmem>>) attributes {dimension_semantics = [#tpu.dimension_semantics<parallel>, #tpu.dimension_semantics<parallel>], iteration_bounds = array<i64: 1, 1>, scalar_prefetch = 0 : i64, scratch_operands = 0 : i64, tpu.core_type = #tpu.core_type<tc>, window_params = [{transform_indices = @transform_0, window_bounds = array<i64: 2, 8, 128>}, {transform_indices = @transform_1, window_bounds = array<i64: 8, 128>}, {transform_indices = @transform_2, window_bounds = array<i64: 2, 8, 128>}]} {
    %c0 = arith.constant 0 : index
    %c0_0 = arith.constant 0 : index
    %c0_1 = arith.constant 0 : index
    %0 = vector.load %arg2[%c0, %c0_0, %c0_1] : memref<2x8x128xf32, #tpu.memory_space<vmem>>, vector<2x8x128xf32>
    %cst = arith.constant 11.3137083 : f32
    %1 = vector.broadcast %cst : f32 to vector<2x8x128xf32>
    %2 = arith.mulf %0, %1 : vector<2x8x128xf32>
    %c0_2 = arith.constant 0 : index
    %c0_3 = arith.constant 0 : index
    %3 = vector.load %arg3[%c0_2, %c0_3] : memref<8x128xf32, #tpu.memory_space<vmem>>, vector<8x128xf32>
    %4 = vector.shape_cast %3 : vector<8x128xf32> to vector<1x8x128xf32>
    %5 = vector.broadcast %4 : vector<1x8x128xf32> to vector<2x8x128xf32>
    %6 = arith.addf %2, %5 : vector<2x8x128xf32>
    %c0_4 = arith.constant 0 : index
    %c0_5 = arith.constant 0 : index
    %c0_6 = arith.constant 0 : index
    %7 = vector.load %arg4[%c0_4, %c0_5, %c0_6] : memref<2x8x128xf32, #tpu.memory_space<vmem>>, vector<2x8x128xf32>
    tpu.vector_store %arg4[%c0_4, %c0_5, %c0_6], %6 {strides = array<i32>} : memref<2x8x128xf32, #tpu.memory_space<vmem>>, vector<2x8x128xf32>,
    return
  }
  func.func @transform_0(%arg0: i32, %arg1: i32) -> (i32, i32, i32) {
    %c0_i32 = arith.constant 0 : i32
    %c0_i32_0 = arith.constant 0 : i32
    return %arg1, %arg0, %c0_i32 : i32, i32, i32
  }
  func.func @transform_1(%arg0: i32, %arg1: i32) -> (i32, i32) {
    %c0_i32 = arith.constant 0 : i32
    %c0_i32_0 = arith.constant 0 : i32
    return %arg0, %c0_i32 : i32, i32
  }
  func.func @transform_2(%arg0: i32, %arg1: i32) -> (i32, i32, i32) {
    %c0_i32 = arith.constant 0 : i32
    %c0_i32_0 = arith.constant 0 : i32
    return %arg1, %arg0, %c0_i32 : i32, i32, i32
  }
}

</mosaic_0001>

<bundles_post_ra>
// kernel: tpu_custom_call.1
= control target key start
LH: loop header
LB: loop body
LE: loop exit
PB: predicated region body
PF: predicated region fallthrough
CT: control target
= control target key end

     0   :  { %7 = vsyncpa [#allocation3], 0  ;;  %s171_s0 = inlined_call_operand.hbm [shape: f32[2,8,128], index: 0, kind: input, shape index: {}]   ;;  %s172_s1 = inlined_call_operand.hbm [shape: f32[64,128], index: 1, kind: input, shape index: {}]   ;;  %s173_s2 = inlined_call_operand.hbm [shape: f32[2,8,128], index: 2, kind: output, shape index: {}]  }
   0x1   :  { %8 = vsyncpa [#allocation6], 0 }
   0x2   :  { %9 = vsyncpa [#allocation4], 0  ;;  %s136_s9 = smov [#allocation2]  }
   0x3   :  { %s15_s10 = sshll.u32 %s136_s9, 4  ;;  %s16_s10 = int_to_ptr.vmem [resolvable:$true] %s15_s10 }
   0x4   :  { %s78_s11 = scalar_lea.vmem %s16_s10, 256  ;;  %p83_p1 = scmp.lt.s32.totalorder %s16_s10, %s16_s10 }
   0x5   :  { %p79_p0 = scmp.ne.s32.totalorder %s16_s10, %s78_s11  ;;  %p84_p2 = scmp.lt.s32.totalorder %s78_s11, %s78_s11 }
   0x7   :  { %p85_p3 = por %p84_p2, %p83_p1 }
   0x9   :  { %p86_p4 = pnand %p85_p3, %p79_p0 }
   0xb   :  { %89 = shalt.err (!%p86_p4)
}
   0xc   :  { %s137_s12 = smov 128   ;;  %s138_s13 = smov 8  }
   0xd   :  { %21 = dma.hbm_to_vmem [thread:$0]  %s171_s0, 256, %s16_s10, [#allocation3], %s137_s12, %s137_s12, %s138_s13  }
   0xe   :  { %s139_s16 = smov [#allocation5]  }
   0xf   :  { %s28_s17 = sshll.u32 %s139_s16, 4  ;;  %s29_s17 = int_to_ptr.vmem [resolvable:$true] %s28_s17 }
  0x10   :  { %s98_s18 = scalar_lea.vmem %s29_s17, 128  ;;  %p103_p6 = scmp.lt.s32.totalorder %s29_s17, %s29_s17 }
  0x11   :  { %p99_p5 = scmp.ne.s32.totalorder %s29_s17, %s98_s18  ;;  %p104_p7 = scmp.lt.s32.totalorder %s98_s18, %s98_s18 }
  0x13   :  { %p105_p8 = por %p104_p7, %p103_p6 }
  0x15   :  { %p106_p9 = pnand %p105_p8, %p99_p5 }
  0x17   :  { %109 = shalt.err (!%p106_p9)
}
  0x18   :  { %31 = dma.hbm_to_vmem [thread:$0]  %s172_s1, 128, %s29_s17, [#allocation6]  }
  0x19   :  { %130 = dma.done.wait [#allocation3], 256  }
  0x1a   :  { %131 = vsyncadd [#allocation3], 4294967040 }
  0x1b   :  { %132 = dma.done.wait [#allocation6], 128  }
  0x1c   :  { %133 = vsyncadd [#allocation6], 4294967168  ;;  %v38_v0 = vld [vmem:[#allocation2] sm:$0xff]  ;;  %v42_v1 = vld [vmem:[#allocation5] sm:$0xff]  ;;  %s140_s0 = smov [#allocation7]  }
  0x1d   :  { %v39_v2 = vld [vmem:[#allocation2 + $0x8] sm:$0xff]  ;;  %s52_s21 = sshll.u32 %s140_s0, 4  ;;  %v40_v3 = vmul.f32 11.313708, %v38_v0  ;;  %s53_s21 = int_to_ptr.vmem [resolvable:$true] %s52_s21 }
  0x1e   :  { %v41_v4 = vmul.f32 11.313708, %v39_v2  ;;  %s110_s22 = scalar_lea.vmem %s53_s21, 256  ;;  %p115_p11 = scmp.lt.s32.totalorder %s53_s21, %s53_s21 }
  0x1f   :  { %v43_v5 = vadd.f32 %v42_v1, %v40_v3  ;;  %p111_p10 = scmp.ne.s32.totalorder %s53_s21, %s110_s22  ;;  %p116_p12 = scmp.lt.s32.totalorder %s110_s22, %s110_s22 }
  0x20   :  { %v44_v6 = vadd.f32 %v42_v1, %v41_v4 }
  0x21   :  { %45 = vst [vmem:[#allocation7] sm:$0xff] %v43_v5  ;;  %p117_p13 = por %p116_p12, %p115_p11 }
  0x22   :  { %46 = vst [vmem:[#allocation7 + $0x8] sm:$0xff] %v44_v6 }
  0x23   :  { %p118_p0 = pnand %p117_p13, %p111_p10 }
  0x25   :  { %121 = shalt.err (!%p118_p0)
}
  0x26   :  { %58 = dma.vmem_to_hbm [thread:$0]  %s53_s21, 256, %s173_s2, [#allocation4], %s137_s12, %s137_s12, %s138_s13  }
  0x27   :  { %134 = dma.done.wait [#allocation4], 256  }
  0x28   :  { %135 = vsyncadd [#allocation4], 4294967040 }
  0x29   :  { %62 = vsyncpa [#allocation3], 1 }
  0x2a   :  { %63 = vsyncpa [#allocation6], 1 }
  0x2b   :  { %64 = vsyncpa [#allocation4], 1 }

</bundles_post_ra>
